<compile_context>
chip_gen: v6e
topology: v6e:2x2x1
jax: 0.10.0
libtpu: 0.0.40
codegen_flags: <defaults>
</compile_context>

<pallas_src>
import functools

import jax
import jax.numpy as jnp
from jax import lax
from jax.experimental import pallas as pl
from jax.experimental.pallas import tpu as pltpu


# ----------------------------------------------------------------------------
# Linear kernel: y = x @ W + b   (weight pre-transposed on host -> plain MXU GEMM)
# ----------------------------------------------------------------------------
def _linear_kernel(x_ref, w_ref, b_ref, o_ref):
    # x_ref: (tile_m, K)  w_ref: (K, tile_n)  b_ref: (1, tile_n)  o_ref: (tile_m, tile_n)
    acc = jnp.dot(x_ref[...], w_ref[...], preferred_element_type=jnp.float32)
    o_ref[...] = (acc + b_ref[...].astype(jnp.float32)).astype(o_ref.dtype)


# Conservative per-call VMEM footprint target: fits every generation's default
# scoped VMEM (v5e 16 MiB, v6e/v7x 32 MiB) with headroom, and v7x's 64 MiB total.
_VMEM_BUDGET = 12 * 1024 * 1024


def _linear_tiles(m, k, out_f, itemsize):
    """Pick (tile_m, tile_n) whose double-buffered footprint fits the budget."""

    def footprint(tm, tn):
        # 2x row tile + 2x out tile + 2x weight tile + bias + f32 accumulator
        return itemsize * (2 * tm * k + 2 * tm * tn + 2 * k * tn + 2 * tn) + 4 * tm * tn

    # Prefer keeping the whole weight VMEM-resident; tile OUT only when needed
    # (big C on v7x's smaller VMEM).
    n_cands = [out_f] + [c for c in (2048, 1024, 512, 256, 128)
                         if c < out_f and out_f % c == 0]
    # Full-extent row block for small M; fixed pipeline-friendly tiles otherwise
    # (never a single huge full-M block).
    m_cands = [m] if m <= 512 else [512, 256, 128]

    for tn in n_cands:
        for tm in m_cands:
            if footprint(tm, tn) <= _VMEM_BUDGET:
                return tm, tn
    return m_cands[-1], n_cands[-1]


def pallas_linear(x2d, w_t, bias):
    """x2d: (M, K), w_t: (K, OUT) (pre-transposed), bias: (OUT,) -> (M, OUT)."""
    m, k = x2d.shape
    k2, out_f = w_t.shape
    assert k == k2
    itemsize = jnp.dtype(x2d.dtype).itemsize

    tile_m, tile_n = _linear_tiles(m, k, out_f, itemsize)

    # Pad rows to a multiple of tile_m instead of degenerating to one full block.
    m_pad = -(-m // tile_m) * tile_m
    x_in = x2d if m_pad == m else jnp.pad(x2d, ((0, m_pad - m), (0, 0)))
    b2d = bias.reshape(1, out_f)

    cost = pl.CostEstimate(
        flops=2 * m_pad * k * out_f,
        transcendentals=0,
        bytes_accessed=int(itemsize * (m_pad * k + k * out_f + out_f + m_pad * out_f)),
    )

    out = pl.pallas_call(
        _linear_kernel,
        out_shape=jax.ShapeDtypeStruct((m_pad, out_f), x2d.dtype),
        grid_spec=pltpu.PrefetchScalarGridSpec(
            num_scalar_prefetch=0,
            grid=(m_pad // tile_m, out_f // tile_n),
            in_specs=[
                pl.BlockSpec((tile_m, k), lambda i, j: (i, 0)),   # row tile (pipelined)
                pl.BlockSpec((k, tile_n), lambda i, j: (0, j)),   # weight: resident / col-tiled
                pl.BlockSpec((1, tile_n), lambda i, j: (0, j)),   # bias
            ],
            out_specs=pl.BlockSpec((tile_m, tile_n), lambda i, j: (i, j)),
        ),
        compiler_params=pltpu.CompilerParams(
            dimension_semantics=("parallel", "parallel")),
        cost_estimate=cost,
    )(x_in, w_t, b2d)
    return out if m_pad == m else out[:m]


# ----------------------------------------------------------------------------
# Attention kernel: one batch element per grid step, all heads per step.
# Reads the fused QKV block (1, N, 3C); writes a lane-dense (1, N, C) block.
# ----------------------------------------------------------------------------
def _attention_kernel(qkv_ref, o_ref, *, num_heads, head_dim):
    c = num_heads * head_dim
    qkv = qkv_ref[0]                                  # (N, 3C), single full-tile load
    outs = []
    for h in range(num_heads):                        # static unroll over heads
        lo = h * head_dim
        q = qkv[:, lo:lo + head_dim]                  # (N, Dh)  (already scale-folded)
        k = qkv[:, c + lo:c + lo + head_dim]          # (N, Dh)
        v = qkv[:, 2 * c + lo:2 * c + lo + head_dim]  # (N, Dh)

        # scores = q @ k.T with f32 accumulation
        s = lax.dot_general(
            q, k,
            dimension_numbers=(((1,), (1,)), ((), ())),
            preferred_element_type=jnp.float32,
        )                                             # (N, N) f32

        # Numerically-stable softmax over keys; reciprocal on the EUP slot.
        m = jnp.max(s, axis=-1, keepdims=True)
        e = jnp.exp(s - m)
        denom = jnp.sum(e, axis=-1, keepdims=True)
        p = e * pl.reciprocal(denom, approx=True)

        o = jnp.dot(p.astype(v.dtype), v, preferred_element_type=jnp.float32)
        outs.append(o.astype(o_ref.dtype))

    # Merge heads in VMEM and do one lane-dense (N, C) store (no host transpose).
    o_ref[0] = jnp.concatenate(outs, axis=-1)


def pallas_attention(qkv3, num_heads):
    """qkv3: (B, N, 3C) fused QKV activations -> (B, N, C) attention output."""
    bsz, seq, three_c = qkv3.shape
    c = three_c // 3
    dh = c // num_heads
    itemsize = jnp.dtype(qkv3.dtype).itemsize

    kernel = functools.partial(_attention_kernel, num_heads=num_heads, head_dim=dh)
    cost = pl.CostEstimate(
        flops=4 * bsz * num_heads * seq * seq * dh,
        transcendentals=bsz * num_heads * seq * seq,
        bytes_accessed=int(itemsize * (bsz * seq * three_c + bsz * seq * c)),
    )

    return pl.pallas_call(
        kernel,
        out_shape=jax.ShapeDtypeStruct((bsz, seq, c), qkv3.dtype),
        grid_spec=pltpu.PrefetchScalarGridSpec(
            num_scalar_prefetch=0,
            grid=(bsz,),
            in_specs=[pl.BlockSpec((1, seq, three_c), lambda b: (b, 0, 0))],
            out_specs=pl.BlockSpec((1, seq, c), lambda b: (b, 0, 0)),
        ),
        compiler_params=pltpu.CompilerParams(dimension_semantics=("parallel",)),
        cost_estimate=cost,
    )(qkv3)


# ----------------------------------------------------------------------------
# Full module forward (visualize=False path of Attention.forward)
# ----------------------------------------------------------------------------
def attention_forward(x, in_proj_weight, in_proj_bias, out_proj_weight,
                      out_proj_bias, num_heads):
    """x: (B, N, C). Returns (B, N, C)."""
    bsz, seq, c = x.shape
    dh = c // num_heads
    scale = jnp.asarray(float(dh) ** -0.5, dtype=in_proj_weight.dtype)

    # Fold the softmax scale into the static Q partition (rows [0, C) of the
    # torch-layout in_proj weight / bias): scale*(x@Wq.T + bq) == x@(scale*Wq).T + scale*bq.
    row_scale = jnp.concatenate([
        jnp.full((c,), scale, dtype=in_proj_weight.dtype),
        jnp.ones((2 * c,), dtype=in_proj_weight.dtype),
    ])
    in_w = in_proj_weight * row_scale[:, None]
    in_b = in_proj_bias * row_scale

    # Pre-transpose static weights once on the host so the GEMM kernels issue a
    # plain x @ W MXU matmul (no per-tile transpose of the (OUT, K) weight).
    in_w_t = in_w.T                  # (C, 3C)
    out_w_t = out_proj_weight.T      # (C, C)

    # 1) fused QKV projection
    x2d = x.reshape(bsz * seq, c)
    qkv = pallas_linear(x2d, in_w_t, in_b)                         # (B*N, 3C)

    # 2+3) attention; head split/merge done in VMEM inside the kernel
    #      (the reshape below is metadata-only, no HBM pass)
    o = pallas_attention(qkv.reshape(bsz, seq, 3 * c), num_heads)  # (B, N, C)

    # 4) output projection (reshape is metadata-only)
    out = pallas_linear(o.reshape(bsz * seq, c), out_w_t, out_proj_bias)
    return out.reshape(bsz, seq, c)


# ----------------------------------------------------------------------------
# Pure-JAX reference (mirrors the PyTorch module exactly)
# ----------------------------------------------------------------------------
def reference_attention(x, in_w, in_b, out_w, out_b, num_heads):
    bsz, seq, c = x.shape
    dh = c // num_heads
    scale = float(dh) ** -0.5
    qkv = x @ in_w.T + in_b                                        # (B, N, 3C)
    qkv = qkv.reshape(bsz, seq, 3, num_heads, dh).transpose(2, 0, 3, 1, 4)
    q, k, v = qkv[0], qkv[1], qkv[2]
    q = q * scale
    attn = jnp.einsum('bhqd,bhkd->bhqk', q, k)
    attn = jax.nn.softmax(attn, axis=-1)
    o = jnp.einsum('bhqk,bhkd->bhqd', attn, v)
    o = o.transpose(0, 2, 1, 3).reshape(bsz, seq, c)
    return o @ out_w.T + out_b


if __name__ == "__main__":
    # Small shapes consistent with forward(x: [B, N, C]).
    batch = 2
    seq = 8
    embed_dim = 32
    num_heads = 4

    key = jax.random.PRNGKey(0)
    kx, kwi, kwo = jax.random.split(key, 3)

    x = jax.random.normal(kx, (batch, seq, embed_dim), dtype=jnp.float32)

    # Parameters (xavier-ish weights; biases = 0 as in _reset_parameters).
    in_proj_weight = jax.random.normal(
        kwi, (3 * embed_dim, embed_dim), dtype=jnp.float32) * 0.1
    in_proj_bias = jnp.zeros((3 * embed_dim,), dtype=jnp.float32)
    out_proj_weight = jax.random.normal(
        kwo, (embed_dim, embed_dim), dtype=jnp.float32) * 0.1
    out_proj_bias = jnp.zeros((embed_dim,), dtype=jnp.float32)

    out = attention_forward(x, in_proj_weight, in_proj_bias,
                            out_proj_weight, out_proj_bias, num_heads)
    out = jax.block_until_ready(out)

    ref = reference_attention(x, in_proj_weight, in_proj_bias,
                              out_proj_weight, out_proj_bias, num_heads)

    assert out.shape == (batch, seq, embed_dim)
    # approx reciprocal on the softmax denominator -> slightly relaxed tolerance
    assert jnp.allclose(out, ref, atol=2e-3, rtol=2e-3), (
        float(jnp.max(jnp.abs(out - ref))))

    print("KERNEL_OK")
</pallas_src>

<mosaic_0001>
module attributes {stable_mosaic.version = 11 : i64} {
  func.func @_linear_kernel(%arg0: i32, %arg1: i32, %arg2: memref<16x32xf32, #tpu.memory_space<vmem>>, %arg3: memref<32x96xf32, #tpu.memory_space<vmem>>, %arg4: memref<1x96xf32, #tpu.memory_space<vmem>>, %arg5: memref<16x96xf32, #tpu.memory_space<vmem>>) attributes {dimension_semantics = [#tpu.dimension_semantics<parallel>, #tpu.dimension_semantics<parallel>], iteration_bounds = array<i64: 1, 1>, scalar_prefetch = 0 : i64, scratch_operands = 0 : i64, tpu.core_type = #tpu.core_type<tc>, window_params = [{transform_indices = @transform_0, window_bounds = array<i64: 16, 32>}, {transform_indices = @transform_1, window_bounds = array<i64: 32, 96>}, {transform_indices = @transform_2, window_bounds = array<i64: 1, 96>}, {transform_indices = @transform_3, window_bounds = array<i64: 16, 96>}]} {
    %c0 = arith.constant 0 : index
    %c0_0 = arith.constant 0 : index
    %0 = vector.load %arg2[%c0, %c0_0] : memref<16x32xf32, #tpu.memory_space<vmem>>, vector<16x32xf32>
    %c0_1 = arith.constant 0 : index
    %c0_2 = arith.constant 0 : index
    %1 = vector.load %arg3[%c0_1, %c0_2] : memref<32x96xf32, #tpu.memory_space<vmem>>, vector<32x96xf32>
    %cst = arith.constant dense<0.000000e+00> : vector<16x96xf32>
    %2 = tpu.matmul %0, %1, %cst {dimension_numbers = #tpu.dot_dimension_numbers<[1], [0], [0], [1], [0, 0, 1, 1], [], []>} : vector<16x32xf32>, vector<32x96xf32>, vector<16x96xf32> -> vector<16x96xf32>
    %c0_3 = arith.constant 0 : index
    %c0_4 = arith.constant 0 : index
    %3 = vector.load %arg4[%c0_3, %c0_4] : memref<1x96xf32, #tpu.memory_space<vmem>>, vector<1x96xf32>
    %4 = vector.broadcast %3 : vector<1x96xf32> to vector<16x96xf32>
    %5 = arith.addf %2, %4 : vector<16x96xf32>
    %c0_5 = arith.constant 0 : index
    %c0_6 = arith.constant 0 : index
    %6 = vector.load %arg5[%c0_5, %c0_6] : memref<16x96xf32, #tpu.memory_space<vmem>>, vector<16x96xf32>
    tpu.vector_store %arg5[%c0_5, %c0_6], %5 {strides = array<i32>} : memref<16x96xf32, #tpu.memory_space<vmem>>, vector<16x96xf32>,
    return
  }
  func.func @transform_0(%arg0: i32, %arg1: i32) -> (i32, i32) {
    %c0_i32 = arith.constant 0 : i32
    %c0_i32_0 = arith.constant 0 : i32
    return %arg0, %c0_i32 : i32, i32
  }
  func.func @transform_1(%arg0: i32, %arg1: i32) -> (i32, i32) {
    %c0_i32 = arith.constant 0 : i32
    %c0_i32_0 = arith.constant 0 : i32
    return %c0_i32, %arg1 : i32, i32
  }
  func.func @transform_2(%arg0: i32, %arg1: i32) -> (i32, i32) {
    %c0_i32 = arith.constant 0 : i32
    %c0_i32_0 = arith.constant 0 : i32
    return %c0_i32, %arg1 : i32, i32
  }
  func.func @transform_3(%arg0: i32, %arg1: i32) -> (i32, i32) {
    %c0_i32 = arith.constant 0 : i32
    return %arg0, %arg1 : i32, i32
  }
}

</mosaic_0001>

<bundles_post_ra>
// kernel: tpu_custom_call.1
= control target key start
LH: loop header
LB: loop body
LE: loop exit
PB: predicated region body
PF: predicated region fallthrough
CT: control target
= control target key end

     0   :  { %8 = vsyncpa [#allocation3], 0  ;;  %s298_s0 = inlined_call_operand.hbm [shape: f32[16,32], index: 0, kind: input, shape index: {}]   ;;  %s299_s1 = inlined_call_operand.hbm [shape: f32[32,96], index: 1, kind: input, shape index: {}]   ;;  %s300_s2 = inlined_call_operand.vmem [shape: f32[1,96], index: 2, kind: input, shape index: {}]   ;;  %s301_s3 = inlined_call_operand.hbm [shape: f32[16,96], index: 3, kind: output, shape index: {}]  }
   0x1   :  { %9 = vsyncpa [#allocation6], 0 }
   0x2   :  { %10 = vsyncpa [#allocation4], 0  ;;  %s250_s12 = smov [#allocation2]  }
   0x3   :  { %s16_s13 = sshll.u32 %s250_s12, 4  ;;  %s17_s13 = int_to_ptr.vmem [resolvable:$true] %s16_s13 }
   0x4   :  { %s192_s14 = scalar_lea.vmem %s17_s13, 256  ;;  %p197_p1 = scmp.lt.s32.totalorder %s17_s13, %s17_s13 }
   0x5   :  { %p193_p0 = scmp.ne.s32.totalorder %s17_s13, %s192_s14  ;;  %p198_p2 = scmp.lt.s32.totalorder %s192_s14, %s192_s14 }
   0x7   :  { %p199_p3 = por %p198_p2, %p197_p1 }
   0x9   :  { %p200_p4 = pnand %p199_p3, %p193_p0 }
   0xb   :  { %203 = shalt.err (!%p200_p4)
}
   0xc   :  { %s251_s15 = smov 128   ;;  %s252_s16 = smov 8  }
   0xd   :  { %22 = dma.hbm_to_vmem [thread:$0]  %s298_s0, 256, %s17_s13, [#allocation3], %s251_s15, %s251_s15, %s252_s16  }
   0xe   :  { %s253_s19 = smov [#allocation5]  }
   0xf   :  { %s28_s20 = sshll.u32 %s253_s19, 4  ;;  %s29_s20 = int_to_ptr.vmem [resolvable:$true] %s28_s20 }
  0x10   :  { %s212_s21 = scalar_lea.vmem %s29_s20, 512  ;;  %p217_p6 = scmp.lt.s32.totalorder %s29_s20, %s29_s20 }
  0x11   :  { %p213_p5 = scmp.ne.s32.totalorder %s29_s20, %s212_s21  ;;  %p218_p7 = scmp.lt.s32.totalorder %s212_s21, %s212_s21 }
  0x13   :  { %p219_p8 = por %p218_p7, %p217_p6 }
  0x15   :  { %p220_p9 = pnand %p219_p8, %p213_p5 }
  0x17   :  { %223 = shalt.err (!%p220_p9)
}
  0x18   :  { %34 = dma.hbm_to_vmem [thread:$0]  %s299_s1, 512, %s29_s20, [#allocation6], %s251_s15, %s251_s15, %s252_s16  }
  0x19   :  { %244 = dma.done.wait [#allocation3], 256  }
  0x1a   :  { %245 = vsyncadd [#allocation3], 4294967040 }
  0x1b   :  { %246 = dma.done.wait [#allocation6], 512  }
  0x1c   :  { %247 = vsyncadd [#allocation6], 4294966784  ;;  %vm56_vm0 = vcmask 261120   ;;  %v48_v0 = vld [vmem:[#allocation5 + $0x18] sm:$0xff]  ;;  %v47_v1 = vld [vmem:[#allocation5 + $0x10] sm:$0xff]  ;;  %vm138_vm1 = vcmask 785408  }
  0x1d   :  { %168 = vmatprep.subr.mxu0 %v48_v0  ;;  %v43_v2 = vld [vmem:[#allocation2] sm:$0xff]  ;;  %v46_v3 = vld [vmem:[#allocation5 + $0x8] sm:$0xff]  ;;  %v45_v4 = vld [vmem:[#allocation5] sm:$0xff]  ;;  %s254_s24 = smov [#allocation7]  }
  0x1e   :  { %169 = vmatpush3.msra.mxu0 %v48_v0  ;;  %176 = vmatprep.mubr.msk.f32.mxu0 %vm56_vm0, %v43_v2  ;;  %v44_v5 = vld [vmem:[#allocation2 + $0x8] sm:$0xff]  ;;  %v159_v6 = vld [vmem:[%s300_s2] ss:$0 sm:$0xff]  ;;  %s146_s25 = sshll.u32 %s254_s24, 4  ;;  %s147_s25 = int_to_ptr.vmem [resolvable:$true] %s146_s25 }
  0x1f   :  { %170 = vmatprep.subr.mxu0 %v47_v1  ;;  %s224_s26 = scalar_lea.vmem %s147_s25, 256  ;;  %p229_p11 = scmp.lt.s32.totalorder %s147_s25, %s147_s25 }
  0x20   :  { %171 = vmatpush3.msra.mxu0 %v47_v1  ;;  %p225_p10 = scmp.ne.s32.totalorder %s147_s25, %s224_s26  ;;  %p230_p12 = scmp.lt.s32.totalorder %s224_s26, %s224_s26 }
  0x21   :  { %172 = vmatprep.subr.mxu0 %v46_v3 }
  0x22   :  { %173 = vmatpush3.msra.mxu0 %v46_v3  ;;  %p231_p13 = por %p230_p12, %p229_p11 }
  0x23   :  { %174 = vmatprep.subr.mxu0 %v45_v4 }
  0x24   :  { %175 = vmatpush3.msra.mxu0 %v45_v4  ;;  %p232_p0 = pnand %p231_p13, %p225_p10 }
  0x25   :  { %177 = vmatmul.mubr.msk.f32.vlgmr.msra.gmra.mxu0 %vm56_vm0, %v44_v5 }
  0xe5   :  { %v178_v7 = vpop.f32.mrf.mxu0 }
  0xe6   :  { %v135_v8 = vadd.f32 %v178_v7, %v159_v6 }
  0xe7   :  { %v129_v9 = vpop.f32.mrf.mxu0 }
  0xe8   :  { %v130_v10 = vadd.f32 %v159_v6, %v129_v9  ;;  %140 = vst.msk [vmem:[#allocation7 + $0x8] sm:$0xff] %vm138_vm1, %v135_v8 }
  0xea   :  { %139 = vst.msk [vmem:[#allocation7] sm:$0xff] %vm138_vm1, %v130_v10 }
  0xeb   :  { %235 = shalt.err (!%p232_p0)
}
  0xec   :  { %152 = dma.vmem_to_hbm [thread:$0]  %s147_s25, 256, %s301_s3, [#allocation4], %s251_s15, %s251_s15, %s252_s16  }
  0xed   :  { %248 = dma.done.wait [#allocation4], 256  }
  0xee   :  { %249 = vsyncadd [#allocation4], 4294967040 }
  0xef   :  { %156 = vsyncpa [#allocation3], 1 }
  0xf0   :  { %157 = vsyncpa [#allocation6], 1 }
  0xf1   :  { %158 = vsyncpa [#allocation4], 1 }

</bundles_post_ra>
